<compile_context>
chip_gen: v7x
topology: tpu7x:2x2x1
jax: 0.10.0
libtpu: 0.0.40
codegen_flags: <defaults>
</compile_context>

<pallas_src>
import functools

import jax
import jax.numpy as jnp
from jax import lax
from jax.experimental import pallas as pl
from jax.experimental.pallas import tpu as pltpu


def _finalize(acc_f32, b_ref, logits_ref, probs_ref, topv_ref, topi_ref,
              expert_capacity: int):
    """acc_f32: (E, T) f32 pre-bias logits.  Writes all four output blocks."""
    logits = acc_f32 + b_ref[...].astype(jnp.float32)             # (E, T) f32
    logits_ref[...] = logits.astype(logits_ref.dtype)

    # Softmax over the TOKEN axis (dim=0 of the PyTorch reference), here the lane axis.
    m = jnp.max(logits, axis=1, keepdims=True)                    # (E, 1)
    e = jnp.exp(logits - m)
    inv = pl.reciprocal(jnp.sum(e, axis=1, keepdims=True), approx=True)
    probs = e * inv                                               # (E, T) f32
    probs_ref[...] = probs.astype(probs_ref.dtype)

    # Iterative top-k over tokens (lanes); lowest token index wins exact ties.
    num_e, num_t = probs.shape
    token_ids = lax.broadcasted_iota(jnp.int32, (num_e, num_t), 1)
    cap_ids = lax.broadcasted_iota(jnp.int32, (num_e, expert_capacity), 1)
    vals = jnp.zeros((num_e, expert_capacity), jnp.float32)
    idxs = jnp.zeros((num_e, expert_capacity), jnp.int32)
    work = probs
    for c in range(expert_capacity):
        best = jnp.max(work, axis=1, keepdims=True)               # (E, 1)
        idx = jnp.min(jnp.where(work == best, token_ids, num_t),
                      axis=1, keepdims=True)                      # (E, 1) int32
        vals = jnp.where(cap_ids == c, best, vals)
        idxs = jnp.where(cap_ids == c, idx, idxs)
        if c + 1 < expert_capacity:
            work = jnp.where(token_ids == idx, -jnp.inf, work)
    # Single lane-dense store per output instead of C masked 1-lane column stores.
    topv_ref[...] = vals.astype(topv_ref.dtype)
    topi_ref[...] = idxs


def _router_kernel(x_ref, w_ref, b_ref,
                   logits_ref, probs_ref, topv_ref, topi_ref,
                   *scratch, expert_capacity: int, multi_step: bool):
    # Partial GEMM in token-on-lanes orientation:
    #   (E, tk) . (T, tk)^T -> (E, T), f32 accumulation on the MXU.
    partial = lax.dot_general(
        w_ref[...], x_ref[...],
        dimension_numbers=(((1,), (1,)), ((), ())),
        preferred_element_type=jnp.float32)

    if multi_step:
        acc_ref, = scratch
        kk = pl.program_id(0)

        @pl.when(kk == 0)
        def _init():
            acc_ref[...] = jnp.zeros_like(acc_ref)

        acc_ref[...] += partial

        @pl.when(kk == pl.num_programs(0) - 1)
        def _fin():
            _finalize(acc_ref[...], b_ref, logits_ref, probs_ref,
                      topv_ref, topi_ref, expert_capacity)
    else:
        # Single-step fast path: no accumulator scratch, no init/finalize gating.
        _finalize(partial, b_ref, logits_ref, probs_ref,
                  topv_ref, topi_ref, expert_capacity)


def _round_up(v: int, m: int) -> int:
    return (v + m - 1) // m * m


def _tile(dim: int, target: int, unit: int = 128) -> int:
    """Largest multiple of `unit` <= target that divides `dim`; else the full dim."""
    if dim % unit == 0:
        t = min(target, dim)
        t -= t % unit
        while t >= unit:
            if dim % t == 0:
                return t
            t -= unit
    return dim


def _vmem_budget_bytes() -> int:
    """~70% of physical VMEM (leaves headroom for compiler-internal scratch)."""
    cap = None
    try:
        cap = getattr(pltpu.get_tpu_info(), "vmem_capacity_bytes", None)
    except Exception:
        cap = None
    if not cap:
        cap = 64 * 1024 * 1024        # conservative fallback: v7x physical VMEM
    return int(cap * 0.70)


def expert_choice_router(x, weight, bias, k, expert_capacity, *, max_k_tile=None):
    """JAX/Pallas equivalent of ExpertChoiceRouter.forward(x, k, expert_capacity).

    `k` is accepted for API parity but (exactly like the PyTorch reference) is unused:
    topk is taken with k=expert_capacity.  `max_k_tile` is a test hook to force the
    K-tiled accumulator path at small shapes.
    """
    del k  # unused in the reference forward as well
    T, D = x.shape
    E, D2 = weight.shape
    assert D2 == D, "weight must be (num_experts, d_model)"
    if expert_capacity > T:
        # torch.topk would raise in this case; mirror that instead of emitting -inf rows.
        raise ValueError("expert_capacity must be <= num_tokens")

    dt = x.dtype
    w = jnp.asarray(weight, dt)                         # (E, D) -- no transpose, no upcast
    b = jnp.asarray(bias, jnp.float32).reshape(E, 1)    # lane-broadcast add in kernel

    # ---- VMEM accounting & K-tile selection -------------------------------------
    itemsize = jnp.dtype(dt).itemsize
    t_sub = _round_up(T, 8)          # sublane rounding of the (T, tk) x tile
    t_lane = _round_up(T, 128)       # lane rounding of the (E, T) buffers
    e_sub = _round_up(E, 8)
    c_lane = _round_up(expert_capacity, 128)

    budget = _vmem_budget_bytes()
    # Fixed (K-tile independent) resident footprint: f32 accumulator, the (E, T)
    # logits / probs output blocks (2x for double-buffer safety), the tiny top-k
    # outputs and the bias tile.
    fixed = (e_sub * t_lane * 4                               # f32 accumulator
             + 2 * e_sub * t_lane * itemsize                  # logits block
             + 2 * e_sub * t_lane * itemsize                  # probs block (input dtype)
             + 2 * e_sub * c_lane * (itemsize + 4)            # expert_probs + indices
             + 2 * e_sub * 128 * 4)                           # bias
    # Per-K-lane cost: double-buffered x tile (T, tk) + W tile (E, tk).
    per_k = 2 * (t_sub + e_sub) * itemsize
    max_tk = max(128, ((budget - fixed) // per_k) // 128 * 128)
    if max_k_tile is not None:
        max_tk = min(max_tk, max_k_tile)
    tk = _tile(D, min(max_tk, D))    # always divides D (or == D as fallback)
    nk = D // tk
    multi_step = nk > 1

    kern = functools.partial(_router_kernel,
                             expert_capacity=expert_capacity,
                             multi_step=multi_step)

    cost = pl.CostEstimate(
        flops=2 * T * D * E,
        transcendentals=T * E,
        bytes_accessed=(x.size * itemsize + w.size * itemsize + b.size * 4
                        + 2 * T * E * itemsize + 2 * E * expert_capacity * 4))

    out_shapes = (
        jax.ShapeDtypeStruct((E, T), dt),                       # logits (token-on-lanes)
        jax.ShapeDtypeStruct((E, T), dt),                       # probs  (token-on-lanes)
        jax.ShapeDtypeStruct((E, expert_capacity), dt),         # expert_probs
        jax.ShapeDtypeStruct((E, expert_capacity), jnp.int32),  # expert_indices
    )

    logits_et, probs_et, expert_probs, expert_indices = pl.pallas_call(
        kern,
        out_shape=out_shapes,
        grid_spec=pltpu.PrefetchScalarGridSpec(
            num_scalar_prefetch=0,
            grid=(nk,),
            in_specs=[
                pl.BlockSpec((T, tk), lambda kk: (0, kk)),      # x  (streamed once)
                pl.BlockSpec((E, tk), lambda kk: (0, kk)),      # W  (E, D)
                pl.BlockSpec((E, 1), lambda kk: (0, 0)),        # b  (E, 1)
            ],
            out_specs=(
                pl.BlockSpec((E, T), lambda kk: (0, 0)),                      # logits
                pl.BlockSpec((E, T), lambda kk: (0, 0)),                      # probs
                pl.BlockSpec((E, expert_capacity), lambda kk: (0, 0)),        # expert_probs
                pl.BlockSpec((E, expert_capacity), lambda kk: (0, 0)),        # expert_indices
            ),
            scratch_shapes=([pltpu.VMEM((E, T), jnp.float32)] if multi_step else []),
        ),
        compiler_params=pltpu.CompilerParams(
            dimension_semantics=("arbitrary",),
            vmem_limit_bytes=budget),
        cost_estimate=cost,
    )(x, w, b)

    # Wrapper-side transpose back to the module's (num_tokens, num_experts) API shape.
    return logits_et.T, probs_et.T, expert_probs, expert_indices


if __name__ == "__main__":
    num_tokens, d_model, num_experts = 64, 1024, 8
    k, expert_capacity = 2, 4

    key = jax.random.PRNGKey(0)
    kx, kw, kb = jax.random.split(key, 3)
    x = jax.random.normal(kx, (num_tokens, d_model), jnp.float32)
    # deterministic nn.Linear-style init (uniform in +-1/sqrt(d_model))
    bound = 1.0 / (d_model ** 0.5)
    weight = jax.random.uniform(kw, (num_experts, d_model), jnp.float32, -bound, bound)
    bias = jax.random.uniform(kb, (num_experts,), jnp.float32, -bound, bound)

    # pure-JAX reference
    ref_logits = x @ weight.T + bias
    ref_probs = jax.nn.softmax(ref_logits, axis=0)
    ref_vals, ref_idx = lax.top_k(ref_probs.T, expert_capacity)   # (E, C)

    # Exercise both the single-step fast path (nk=1) and the K-tiled accumulator path.
    for max_k_tile in (None, 256):
        logits, probs, expert_probs, expert_indices = jax.block_until_ready(
            expert_choice_router(x, weight, bias, k, expert_capacity,
                                 max_k_tile=max_k_tile))

        assert logits.shape == (num_tokens, num_experts)
        assert probs.shape == (num_tokens, num_experts)
        assert expert_probs.shape == (num_experts, expert_capacity)
        assert expert_indices.shape == (num_experts, expert_capacity)
        assert jnp.allclose(logits, ref_logits, atol=1e-4)
        # approx reciprocal in the softmax denominator -> ~2^-12 relative error budget
        assert jnp.allclose(probs, ref_probs, atol=2e-3)
        assert jnp.allclose(expert_probs, ref_vals, atol=2e-3)
        assert jnp.array_equal(expert_indices, ref_idx.astype(jnp.int32))

    print("KERNEL_OK")
</pallas_src>

<mosaic_0001>
module attributes {stable_mosaic.version = 11 : i64} {
  func.func @_router_kernel(%arg0: i32, %arg1: memref<64x1024xf32, #tpu.memory_space<vmem>>, %arg2: memref<8x1024xf32, #tpu.memory_space<vmem>>, %arg3: memref<8x1xf32, #tpu.memory_space<vmem>>, %arg4: memref<8x64xf32, #tpu.memory_space<vmem>>, %arg5: memref<8x64xf32, #tpu.memory_space<vmem>>, %arg6: memref<8x4xf32, #tpu.memory_space<vmem>>, %arg7: memref<8x4xi32, #tpu.memory_space<vmem>>) attributes {dimension_semantics = [#tpu.dimension_semantics<arbitrary>], iteration_bounds = array<i64: 1>, scalar_prefetch = 0 : i64, scratch_operands = 0 : i64, tpu.core_type = #tpu.core_type<tc>, window_params = [{transform_indices = @transform_0, window_bounds = array<i64: 64, 1024>}, {transform_indices = @transform_1, window_bounds = array<i64: 8, 1024>}, {pipeline_mode = #tpu.pipeline_mode<synchronous>, transform_indices = @transform_2, window_bounds = array<i64: 8, 1>}, {pipeline_mode = #tpu.pipeline_mode<synchronous>, transform_indices = @transform_3, window_bounds = array<i64: 8, 64>}, {pipeline_mode = #tpu.pipeline_mode<synchronous>, transform_indices = @transform_4, window_bounds = array<i64: 8, 64>}, {pipeline_mode = #tpu.pipeline_mode<synchronous>, transform_indices = @transform_5, window_bounds = array<i64: 8, 4>}, {pipeline_mode = #tpu.pipeline_mode<synchronous>, transform_indices = @transform_6, window_bounds = array<i64: 8, 4>}]} {
    %c0 = arith.constant 0 : index
    %c0_0 = arith.constant 0 : index
    %0 = vector.load %arg2[%c0, %c0_0] : memref<8x1024xf32, #tpu.memory_space<vmem>>, vector<8x1024xf32>
    %c0_1 = arith.constant 0 : index
    %c0_2 = arith.constant 0 : index
    %1 = vector.load %arg1[%c0_1, %c0_2] : memref<64x1024xf32, #tpu.memory_space<vmem>>, vector<64x1024xf32>
    %cst = arith.constant dense<0.000000e+00> : vector<8x64xf32>
    %2 = tpu.matmul %0, %1, %cst {dimension_numbers = #tpu.dot_dimension_numbers<[1], [1], [0], [0], [0, 0, 1, 0], [], []>} : vector<8x1024xf32>, vector<64x1024xf32>, vector<8x64xf32> -> vector<8x64xf32>
    %c0_3 = arith.constant 0 : index
    %c0_4 = arith.constant 0 : index
    %3 = vector.load %arg3[%c0_3, %c0_4] : memref<8x1xf32, #tpu.memory_space<vmem>>, vector<8x1xf32>
    %4 = vector.broadcast %3 : vector<8x1xf32> to vector<8x64xf32>
    %5 = arith.addf %2, %4 : vector<8x64xf32>
    %c0_5 = arith.constant 0 : index
    %c0_6 = arith.constant 0 : index
    %6 = vector.load %arg4[%c0_5, %c0_6] : memref<8x64xf32, #tpu.memory_space<vmem>>, vector<8x64xf32>
    tpu.vector_store %arg4[%c0_5, %c0_6], %5 {strides = array<i32>} : memref<8x64xf32, #tpu.memory_space<vmem>>, vector<8x64xf32>,
    %cst_7 = arith.constant dense<0xFF800000> : vector<8xf32>
    %7 = vector.multi_reduction <maximumf>, %5, %cst_7 [1] : vector<8x64xf32> to vector<8xf32>
    %8 = vector.shape_cast %7 : vector<8xf32> to vector<8x1xf32>
    %9 = vector.broadcast %8 : vector<8x1xf32> to vector<8x64xf32>
    %10 = arith.subf %5, %9 : vector<8x64xf32>
    %11 = math.exp %10 : vector<8x64xf32>
    %cst_8 = arith.constant dense<0.000000e+00> : vector<8xf32>
    %12 = vector.multi_reduction <add>, %11, %cst_8 [1] : vector<8x64xf32> to vector<8xf32>
    %13 = vector.shape_cast %12 : vector<8xf32> to vector<8x1xf32>
    %14 = tpu.reciprocal %13 {approx = true} : vector<8x1xf32> -> vector<8x1xf32>
    %15 = vector.broadcast %14 : vector<8x1xf32> to vector<8x64xf32>
    %16 = arith.mulf %11, %15 : vector<8x64xf32>
    %c0_9 = arith.constant 0 : index
    %c0_10 = arith.constant 0 : index
    %17 = vector.load %arg5[%c0_9, %c0_10] : memref<8x64xf32, #tpu.memory_space<vmem>>, vector<8x64xf32>
    tpu.vector_store %arg5[%c0_9, %c0_10], %16 {strides = array<i32>} : memref<8x64xf32, #tpu.memory_space<vmem>>, vector<8x64xf32>,
    %18 = tpu.iota {dimensions = array<i32: 1>} : vector<8x64xi32>
    %19 = tpu.iota {dimensions = array<i32: 1>} : vector<8x4xi32>
    %cst_11 = arith.constant 0.000000e+00 : f32
    %20 = vector.broadcast %cst_11 : f32 to vector<8x4xf32>
    %c0_i32 = arith.constant 0 : i32
    %21 = vector.broadcast %c0_i32 : i32 to vector<8x4xi32>
    %cst_12 = arith.constant dense<0xFF800000> : vector<8xf32>
    %22 = vector.multi_reduction <maximumf>, %16, %cst_12 [1] : vector<8x64xf32> to vector<8xf32>
    %23 = vector.shape_cast %22 : vector<8xf32> to vector<8x1xf32>
    %24 = vector.broadcast %23 : vector<8x1xf32> to vector<8x64xf32>
    %25 = arith.cmpf oeq, %16, %24 : vector<8x64xf32>
    %c64_i32 = arith.constant 64 : i32
    %26 = vector.broadcast %c64_i32 : i32 to vector<8x64xi32>
    %27 = arith.select %25, %18, %26 : vector<8x64xi1>, vector<8x64xi32>
    %cst_13 = arith.constant dense<2147483647> : vector<8xi32>
    %28 = vector.multi_reduction <minsi>, %27, %cst_13 [1] : vector<8x64xi32> to vector<8xi32>
    %29 = vector.shape_cast %28 : vector<8xi32> to vector<8x1xi32>
    %c0_i32_14 = arith.constant 0 : i32
    %30 = vector.broadcast %c0_i32_14 : i32 to vector<8x4xi32>
    %31 = arith.cmpi eq, %19, %30 : vector<8x4xi32>
    %32 = vector.shape_cast %23 : vector<8x1xf32> to vector<8x1xf32>
    %33 = vector.broadcast %32 : vector<8x1xf32> to vector<8x4xf32>
    %34 = arith.select %31, %33, %20 : vector<8x4xi1>, vector<8x4xf32>
    %c0_i32_15 = arith.constant 0 : i32
    %35 = vector.broadcast %c0_i32_15 : i32 to vector<8x4xi32>
    %36 = arith.cmpi eq, %19, %35 : vector<8x4xi32>
    %37 = vector.shape_cast %29 : vector<8x1xi32> to vector<8x1xi32>
    %38 = vector.broadcast %37 : vector<8x1xi32> to vector<8x4xi32>
    %39 = arith.select %36, %38, %21 : vector<8x4xi1>, vector<8x4xi32>
    %40 = vector.broadcast %29 : vector<8x1xi32> to vector<8x64xi32>
    %41 = arith.cmpi eq, %18, %40 : vector<8x64xi32>
    %cst_16 = arith.constant 0xFF800000 : f32
    %42 = vector.broadcast %cst_16 : f32 to vector<8x64xf32>
    %43 = arith.select %41, %42, %16 : vector<8x64xi1>, vector<8x64xf32>
    %cst_17 = arith.constant dense<0xFF800000> : vector<8xf32>
    %44 = vector.multi_reduction <maximumf>, %43, %cst_17 [1] : vector<8x64xf32> to vector<8xf32>
    %45 = vector.shape_cast %44 : vector<8xf32> to vector<8x1xf32>
    %46 = vector.broadcast %45 : vector<8x1xf32> to vector<8x64xf32>
    %47 = arith.cmpf oeq, %43, %46 : vector<8x64xf32>
    %c64_i32_18 = arith.constant 64 : i32
    %48 = vector.broadcast %c64_i32_18 : i32 to vector<8x64xi32>
    %49 = arith.select %47, %18, %48 : vector<8x64xi1>, vector<8x64xi32>
    %cst_19 = arith.constant dense<2147483647> : vector<8xi32>
    %50 = vector.multi_reduction <minsi>, %49, %cst_19 [1] : vector<8x64xi32> to vector<8xi32>
    %51 = vector.shape_cast %50 : vector<8xi32> to vector<8x1xi32>
    %c1_i32 = arith.constant 1 : i32
    %52 = vector.broadcast %c1_i32 : i32 to vector<8x4xi32>
    %53 = arith.cmpi eq, %19, %52 : vector<8x4xi32>
    %54 = vector.shape_cast %45 : vector<8x1xf32> to vector<8x1xf32>
    %55 = vector.broadcast %54 : vector<8x1xf32> to vector<8x4xf32>
    %56 = arith.select %53, %55, %34 : vector<8x4xi1>, vector<8x4xf32>
    %c1_i32_20 = arith.constant 1 : i32
    %57 = vector.broadcast %c1_i32_20 : i32 to vector<8x4xi32>
    %58 = arith.cmpi eq, %19, %57 : vector<8x4xi32>
    %59 = vector.shape_cast %51 : vector<8x1xi32> to vector<8x1xi32>
    %60 = vector.broadcast %59 : vector<8x1xi32> to vector<8x4xi32>
    %61 = arith.select %58, %60, %39 : vector<8x4xi1>, vector<8x4xi32>
    %62 = vector.broadcast %51 : vector<8x1xi32> to vector<8x64xi32>
    %63 = arith.cmpi eq, %18, %62 : vector<8x64xi32>
    %cst_21 = arith.constant 0xFF800000 : f32
    %64 = vector.broadcast %cst_21 : f32 to vector<8x64xf32>
    %65 = arith.select %63, %64, %43 : vector<8x64xi1>, vector<8x64xf32>
    %cst_22 = arith.constant dense<0xFF800000> : vector<8xf32>
    %66 = vector.multi_reduction <maximumf>, %65, %cst_22 [1] : vector<8x64xf32> to vector<8xf32>
    %67 = vector.shape_cast %66 : vector<8xf32> to vector<8x1xf32>
    %68 = vector.broadcast %67 : vector<8x1xf32> to vector<8x64xf32>
    %69 = arith.cmpf oeq, %65, %68 : vector<8x64xf32>
    %c64_i32_23 = arith.constant 64 : i32
    %70 = vector.broadcast %c64_i32_23 : i32 to vector<8x64xi32>
    %71 = arith.select %69, %18, %70 : vector<8x64xi1>, vector<8x64xi32>
    %cst_24 = arith.constant dense<2147483647> : vector<8xi32>
    %72 = vector.multi_reduction <minsi>, %71, %cst_24 [1] : vector<8x64xi32> to vector<8xi32>
    %73 = vector.shape_cast %72 : vector<8xi32> to vector<8x1xi32>
    %c2_i32 = arith.constant 2 : i32
    %74 = vector.broadcast %c2_i32 : i32 to vector<8x4xi32>
    %75 = arith.cmpi eq, %19, %74 : vector<8x4xi32>
    %76 = vector.shape_cast %67 : vector<8x1xf32> to vector<8x1xf32>
    %77 = vector.broadcast %76 : vector<8x1xf32> to vector<8x4xf32>
    %78 = arith.select %75, %77, %56 : vector<8x4xi1>, vector<8x4xf32>
    %c2_i32_25 = arith.constant 2 : i32
    %79 = vector.broadcast %c2_i32_25 : i32 to vector<8x4xi32>
    %80 = arith.cmpi eq, %19, %79 : vector<8x4xi32>
    %81 = vector.shape_cast %73 : vector<8x1xi32> to vector<8x1xi32>
    %82 = vector.broadcast %81 : vector<8x1xi32> to vector<8x4xi32>
    %83 = arith.select %80, %82, %61 : vector<8x4xi1>, vector<8x4xi32>
    %84 = vector.broadcast %73 : vector<8x1xi32> to vector<8x64xi32>
    %85 = arith.cmpi eq, %18, %84 : vector<8x64xi32>
    %cst_26 = arith.constant 0xFF800000 : f32
    %86 = vector.broadcast %cst_26 : f32 to vector<8x64xf32>
    %87 = arith.select %85, %86, %65 : vector<8x64xi1>, vector<8x64xf32>
    %cst_27 = arith.constant dense<0xFF800000> : vector<8xf32>
    %88 = vector.multi_reduction <maximumf>, %87, %cst_27 [1] : vector<8x64xf32> to vector<8xf32>
    %89 = vector.shape_cast %88 : vector<8xf32> to vector<8x1xf32>
    %90 = vector.broadcast %89 : vector<8x1xf32> to vector<8x64xf32>
    %91 = arith.cmpf oeq, %87, %90 : vector<8x64xf32>
    %c64_i32_28 = arith.constant 64 : i32
    %92 = vector.broadcast %c64_i32_28 : i32 to vector<8x64xi32>
    %93 = arith.select %91, %18, %92 : vector<8x64xi1>, vector<8x64xi32>
    %cst_29 = arith.constant dense<2147483647> : vector<8xi32>
    %94 = vector.multi_reduction <minsi>, %93, %cst_29 [1] : vector<8x64xi32> to vector<8xi32>
    %95 = vector.shape_cast %94 : vector<8xi32> to vector<8x1xi32>
    %c3_i32 = arith.constant 3 : i32
    %96 = vector.broadcast %c3_i32 : i32 to vector<8x4xi32>
    %97 = arith.cmpi eq, %19, %96 : vector<8x4xi32>
    %98 = vector.shape_cast %89 : vector<8x1xf32> to vector<8x1xf32>
    %99 = vector.broadcast %98 : vector<8x1xf32> to vector<8x4xf32>
    %100 = arith.select %97, %99, %78 : vector<8x4xi1>, vector<8x4xf32>
    %c3_i32_30 = arith.constant 3 : i32
    %101 = vector.broadcast %c3_i32_30 : i32 to vector<8x4xi32>
    %102 = arith.cmpi eq, %19, %101 : vector<8x4xi32>
    %103 = vector.shape_cast %95 : vector<8x1xi32> to vector<8x1xi32>
    %104 = vector.broadcast %103 : vector<8x1xi32> to vector<8x4xi32>
    %105 = arith.select %102, %104, %83 : vector<8x4xi1>, vector<8x4xi32>
    %c0_31 = arith.constant 0 : index
    %c0_32 = arith.constant 0 : index
    %106 = vector.load %arg6[%c0_31, %c0_32] : memref<8x4xf32, #tpu.memory_space<vmem>>, vector<8x4xf32>
    tpu.vector_store %arg6[%c0_31, %c0_32], %100 {strides = array<i32>} : memref<8x4xf32, #tpu.memory_space<vmem>>, vector<8x4xf32>,
    %c0_33 = arith.constant 0 : index
    %c0_34 = arith.constant 0 : index
    %107 = vector.load %arg7[%c0_33, %c0_34] : memref<8x4xi32, #tpu.memory_space<vmem>>, vector<8x4xi32>
    tpu.vector_store %arg7[%c0_33, %c0_34], %105 {strides = array<i32>} : memref<8x4xi32, #tpu.memory_space<vmem>>, vector<8x4xi32>,
    return
  }
  func.func @transform_0(%arg0: i32) -> (i32, i32) {
    %c0_i32 = arith.constant 0 : i32
    %c0_i32_0 = arith.constant 0 : i32
    return %c0_i32, %arg0 : i32, i32
  }
  func.func @transform_1(%arg0: i32) -> (i32, i32) {
    %c0_i32 = arith.constant 0 : i32
    %c0_i32_0 = arith.constant 0 : i32
    return %c0_i32, %arg0 : i32, i32
  }
  func.func @transform_2(%arg0: i32) -> (i32, i32) {
    %c0_i32 = arith.constant 0 : i32
    %c0_i32_0 = arith.constant 0 : i32
    %c0_i32_1 = arith.constant 0 : i32
    return %c0_i32, %c0_i32_0 : i32, i32
  }
  func.func @transform_3(%arg0: i32) -> (i32, i32) {
    %c0_i32 = arith.constant 0 : i32
    %c0_i32_0 = arith.constant 0 : i32
    %c0_i32_1 = arith.constant 0 : i32
    return %c0_i32, %c0_i32_0 : i32, i32
  }
  func.func @transform_4(%arg0: i32) -> (i32, i32) {
    %c0_i32 = arith.constant 0 : i32
    %c0_i32_0 = arith.constant 0 : i32
    %c0_i32_1 = arith.constant 0 : i32
    return %c0_i32, %c0_i32_0 : i32, i32
  }
  func.func @transform_5(%arg0: i32) -> (i32, i32) {
    %c0_i32 = arith.constant 0 : i32
    %c0_i32_0 = arith.constant 0 : i32
    %c0_i32_1 = arith.constant 0 : i32
    return %c0_i32, %c0_i32_0 : i32, i32
  }
  func.func @transform_6(%arg0: i32) -> (i32, i32) {
    %c0_i32 = arith.constant 0 : i32
    %c0_i32_0 = arith.constant 0 : i32
    %c0_i32_1 = arith.constant 0 : i32
    return %c0_i32, %c0_i32_0 : i32, i32
  }
}

</mosaic_0001>

<bundles_post_ra>
// kernel: tpu_custom_call.1
= control target key start
LH: loop header
LB: loop body
LE: loop exit
PB: predicated region body
PF: predicated region fallthrough
CT: control target
= control target key end

     0   :  { %12 = vsyncpa [#allocation3], 0  ;;  %s882_s0 = inlined_call_operand.hbm [shape: f32[64,1024], index: 0, kind: input, shape index: {}]   ;;  %s883_s1 = inlined_call_operand.hbm [shape: f32[8,1024], index: 1, kind: input, shape index: {}]   ;;  %s884_s2 = inlined_call_operand.vmem [shape: f32[8,1], index: 2, kind: input, shape index: {}]   ;;  %s885_s3 = inlined_call_operand.hbm [shape: f32[8,64], index: 3, kind: output, shape index: {0}]   ;;  %s886_s4 = inlined_call_operand.hbm [shape: f32[8,64], index: 4, kind: output, shape index: {1}]   ;;  %s887_s5 = inlined_call_operand.vmem [shape: f32[8,4], index: 5, kind: output, shape index: {2}]   ;;  %s888_s6 = inlined_call_operand.vmem [shape: s32[8,4], index: 6, kind: output, shape index: {3}]  }
   0x1   :  { %13 = vsyncpa [#allocation6], 0 }
   0x2   :  { %14 = vsyncpa [#allocation4], 0 }
   0x3   :  { %15 = vsyncpa [#allocation9], 0  ;;  %s737_s21 = smov [#allocation2]   ;;  %s641_s25 = scalar_lea.hbm %s882_s0, 8192 }
   0x4   :  { %s21_s22 = sshll.u32 %s737_s21, 4  ;;  %p642_p0 = scmp.ne.s32.totalorder %s882_s0, %s641_s25  ;;  %s22_s22 = int_to_ptr.vmem [resolvable:$true] %s21_s22 }
   0x5   :  { %p645_p1 = scmp.lt.u32.totalorder %s641_s25, %s882_s0 }
   0x7   :  { %p647_p2 = pnand %p645_p1, %p642_p0 }
   0x9   :  { %650 = shalt.err (!%p647_p2)
}
   0xa   :  { %s651_s30 = scalar_lea.vmem %s22_s22, 8192  ;;  %p656_p4 = scmp.lt.s32.totalorder %s22_s22, %s22_s22 }
   0xb   :  { %p652_p3 = scmp.ne.s32.totalorder %s22_s22, %s651_s30  ;;  %p657_p5 = scmp.lt.s32.totalorder %s651_s30, %s651_s30 }
   0xd   :  { %p658_p6 = por %p657_p5, %p656_p4 }
   0xf   :  { %p659_p7 = pnand %p658_p6, %p652_p3 }
  0x11   :  { %662 = shalt.err (!%p659_p7)
}
  0x12   :  { %s738_s7 = smov 1024   ;;  %s739_s8 = smov 64  }
  0x13   :  { %27 = dma.hbm_to_vmem [thread:$0]  %s882_s0, 8192, %s22_s22, [#allocation3], %s738_s7, %s738_s7, %s739_s8  }
  0x14   :  { %s740_s11 = smov [#allocation5]   ;;  %s663_s15 = scalar_lea.hbm %s883_s1, 1024 }
  0x15   :  { %s34_s12 = sshll.u32 %s740_s11, 4  ;;  %p664_p8 = scmp.ne.s32.totalorder %s883_s1, %s663_s15  ;;  %s35_s12 = int_to_ptr.vmem [resolvable:$true] %s34_s12 }
  0x16   :  { %p667_p9 = scmp.lt.u32.totalorder %s663_s15, %s883_s1 }
  0x18   :  { %p669_p10 = pnand %p667_p9, %p664_p8 }
  0x1a   :  { %672 = shalt.err (!%p669_p10)
}
  0x1b   :  { %s673_s20 = scalar_lea.vmem %s35_s12, 1024  ;;  %p678_p12 = scmp.lt.s32.totalorder %s35_s12, %s35_s12 }
  0x1c   :  { %p674_p11 = scmp.ne.s32.totalorder %s35_s12, %s673_s20  ;;  %p679_p13 = scmp.lt.s32.totalorder %s673_s20, %s673_s20 }
  0x1e   :  { %p680_p0 = por %p679_p13, %p678_p12 }
  0x20   :  { %p681_p1 = pnand %p680_p0, %p674_p11 }
  0x22   :  { %684 = shalt.err (!%p681_p1)
}
  0x23   :  { %37 = dma.hbm_to_vmem [thread:$0]  %s883_s1, 1024, %s35_s12, [#allocation6]  }
  0x24   :  { %729 = dma.done.wait [#allocation3], 8192  }
  0x25   :  { %730 = vsyncadd [#allocation3], 4294959104 }
  0x26   :  { %731 = dma.done.wait [#allocation6], 1024  }
  0x27   :  { %732 = vsyncadd [#allocation6], 4294966272  ;;  %v741_v0 = vmov 0   ;;  %v55_v1 = vld [vmem:[#allocation2 + $0x8] sm:$0xff]  ;;  %v54_v6 = vld [vmem:[#allocation2] sm:$0xff]  ;;  %vm404_vm0 = vcmask 523264  }
  0x28   :  { %636 = vset.pattern.permute.xlu0 %v741_v0  ;;  %v63_v2 = vld [vmem:[#allocation2 + $0x48] sm:$0xff]  ;;  %v62_v7 = vld [vmem:[#allocation2 + $0x40] sm:$0xff]  ;;  %v57_v49 = vld [vmem:[#allocation2 + $0x18] sm:$0xff]  ;;  %vm518_vm14 = vcmask 31744   ;;  %s742_s24 = smov [#allocation7]   ;;  %s743_s26 = smov [#allocation8]  }
  0x29   :  { %v59_v3 = vld [vmem:[#allocation2 + $0x28] sm:$0xff]  ;;  %v559_v4 = vpack.c.bf16 %v63_v2, %v55_v1  ;;  %v561_v9 = vpack.c.bf16 %v62_v7, %v54_v6  ;;  %v58_v10 = vld [vmem:[#allocation2 + $0x20] sm:$0xff]  ;;  %v65_v50 = vld [vmem:[#allocation2 + $0x58] sm:$0xff]  ;;  %s527_s25 = sshll.u32 %s742_s24, 4  ;;  %s537_s27 = sshll.u32 %s743_s26, 4  ;;  %s528_s25 = int_to_ptr.vmem [resolvable:$true] %s527_s25  ;;  %s538_s27 = int_to_ptr.vmem [resolvable:$true] %s537_s27 }
  0x2a   :  { %v67_v5 = vld [vmem:[#allocation2 + $0x68] sm:$0xff]  ;;  %v66_v11 = vld [vmem:[#allocation2 + $0x60] sm:$0xff]  ;;  %v61_v51 = vld [vmem:[#allocation2 + $0x38] sm:$0xff]  ;;  %v575_v56 = vpack.c.bf16 %v65_v50, %v57_v49  ;;  %s685_s28 = scalar_lea.vmem %s528_s25, 128  ;;  %p690_p3 = scmp.lt.s32.totalorder %s528_s25, %s528_s25 }
  0x2b   :  { %v591_v8 = vpack.c.bf16 %v67_v5, %v59_v3  ;;  %v71_v12 = vld [vmem:[#allocation2 + $0x88] sm:$0xff]  ;;  %560 = vmatprep.subr.bf16.mxu1 %v559_v4  ;;  %v593_v13 = vpack.c.bf16 %v66_v11, %v58_v10  ;;  %v70_v19 = vld [vmem:[#allocation2 + $0x80] sm:$0xff]  ;;  %v69_v52 = vld [vmem:[#allocation2 + $0x78] sm:$0xff]  ;;  %p686_p2 = scmp.ne.s32.totalorder %s528_s25, %s685_s28  ;;  %p691_p4 = scmp.lt.s32.totalorder %s685_s28, %s685_s28 }
  0x2c   :  { %v79_v14 = vld [vmem:[#allocation2 + $0xc8] sm:$0xff]  ;;  %562 = vmatpush1.bf16.xpose.msra.mxu1 %v561_v9  ;;  %v78_v20 = vld [vmem:[#allocation2 + $0xc0] sm:$0xff]  ;;  %v607_v57 = vpack.c.bf16 %v69_v52, %v61_v51  ;;  %v56_v58 = vld [vmem:[#allocation2 + $0x10] sm:$0xff] }
  0x2d   :  { %v75_v15 = vld [vmem:[#allocation2 + $0xa8] sm:$0xff]  ;;  %592 = vmatprep.subr.bf16.mxu0 %v591_v8  ;;  %v563_v17 = vpack.c.bf16 %v79_v14, %v71_v12  ;;  %v74_v21 = vld [vmem:[#allocation2 + $0xa0] sm:$0xff]  ;;  %v565_v27 = vpack.c.bf16 %v78_v20, %v70_v19  ;;  %v64_v59 = vld [vmem:[#allocation2 + $0x50] sm:$0xff]  ;;  %p692_p5 = por %p691_p4, %p690_p3 }
  0x2e   :  { %v83_v16 = vld [vmem:[#allocation2 + $0xe8] sm:$0xff]  ;;  %594 = vmatpush1.bf16.xpose.msra.mxu0 %v593_v13  ;;  %v82_v22 = vld [vmem:[#allocation2 + $0xe0] sm:$0xff]  ;;  %v60_v60 = vld [vmem:[#allocation2 + $0x30] sm:$0xff]  ;;  %v577_v3 = vpack.c.bf16 %v64_v59, %v56_v58  ;;  %v418_v59 = vlaneseq }
  0x2f   :  { %v595_v18 = vpack.c.bf16 %v83_v16, %v75_v15  ;;  %564 = vmatprep.subr.bf16.mxu1 %v563_v17  ;;  %v87_v23 = vld [vmem:[#allocation2 + $0x108] sm:$0xff]  ;;  %v597_v28 = vpack.c.bf16 %v82_v22, %v74_v21  ;;  %v86_v33 = vld [vmem:[#allocation2 + $0x100] sm:$0xff]  ;;  %v68_v61 = vld [vmem:[#allocation2 + $0x70] sm:$0xff]  ;;  %p693_p6 = pnand %p692_p5, %p686_p2 }
  0x30   :  { %v95_v24 = vld [vmem:[#allocation2 + $0x148] sm:$0xff]  ;;  %v94_v34 = vld [vmem:[#allocation2 + $0x140] sm:$0xff]  ;;  %v73_v62 = vld [vmem:[#allocation2 + $0x98] sm:$0xff]  ;;  %v609_v5 = vpack.c.bf16 %v68_v61, %v60_v60  ;;  %v811_v60 = vand.u32 127, %v418_v59 }
  0x31   :  { %596 = vmatprep.subr.bf16.mxu0 %v595_v18  ;;  %v91_v25 = vld [vmem:[#allocation2 + $0x128] sm:$0xff]  ;;  %v567_v29 = vpack.c.bf16 %v95_v24, %v87_v23  ;;  %v90_v35 = vld [vmem:[#allocation2 + $0x120] sm:$0xff]  ;;  %v569_v41 = vpack.c.bf16 %v94_v34, %v86_v33  ;;  %v81_v63 = vld [vmem:[#allocation2 + $0xd8] sm:$0xff] }
  0x32   :  { %v99_v26 = vld [vmem:[#allocation2 + $0x168] sm:$0xff]  ;;  %v98_v36 = vld [vmem:[#allocation2 + $0x160] sm:$0xff]  ;;  %v77_v0 = vld [vmem:[#allocation2 + $0xb8] sm:$0xff]  ;;  %v579_v6 = vpack.c.bf16 %v81_v63, %v73_v62  ;;  %vm440_vm6 = vcmp.eq.s32.totalorder %v811_v60, 0  ;;  %vm465_vm7 = vcmp.eq.s32.totalorder %v811_v60, 1  ;;  %vm490_vm11 = vcmp.eq.s32.totalorder %v811_v60, 2 }
  0x33   :  { %v599_v30 = vpack.c.bf16 %v99_v26, %v91_v25  ;;  %v47_v31 = vld [vmem:[#allocation5 + $0x8] sm:$0xff]  ;;  %v601_v42 = vpack.c.bf16 %v98_v36, %v90_v35  ;;  %v102_v45 = vld [vmem:[#allocation2 + $0x180] sm:$0xff]  ;;  %v85_v1 = vld [vmem:[#allocation2 + $0xf8] sm:$0xff]  ;;  %vm515_vm13 = vcmp.eq.s32.totalorder %v811_v60, 3 }
  0x34   :  { %188 = vmatprep.mubr.f32.mxu1 %v47_v31  ;;  %v51_v32 = vld [vmem:[#allocation5 + $0x28] sm:$0xff]  ;;  %566 = vmatpush1.bf16.xpose.msra.mxu1 %v565_v27  ;;  %v110_v46 = vld [vmem:[#allocation2 + $0x1c0] sm:$0xff]  ;;  %v611_v7 = vpack.c.bf16 %v85_v1, %v77_v0  ;;  %v49_v8 = vld [vmem:[#allocation5 + $0x18] sm:$0xff] }
  0x35   :  { %328 = vmatprep.mubr.f32.mxu0 %v51_v32  ;;  %568 = vmatprep.subr.bf16.mxu1 %v567_v29  ;;  %v103_v37 = vld [vmem:[#allocation2 + $0x188] sm:$0xff]  ;;  %v106_v47 = vld [vmem:[#allocation2 + $0x1a0] sm:$0xff]  ;;  %v573_v53 = vpack.c.bf16 %v110_v46, %v102_v45  ;;  %v53_v9 = vld [vmem:[#allocation5 + $0x38] sm:$0xff] }
  0x36   :  { %598 = vmatpush1.bf16.xpose.msra.mxu0 %v597_v28  ;;  %v111_v38 = vld [vmem:[#allocation2 + $0x1c8] sm:$0xff]  ;;  %v114_v48 = vld [vmem:[#allocation2 + $0x1e0] sm:$0xff]  ;;  %v72_v10 = vld [vmem:[#allocation2 + $0x90] sm:$0xff] }
  0x37   :  { %600 = vmatprep.subr.bf16.mxu0 %v599_v30  ;;  %v107_v39 = vld [vmem:[#allocation2 + $0x1a8] sm:$0xff]  ;;  %v571_v43 = vpack.c.bf16 %v111_v38, %v103_v37  ;;  %v118_v54 = vld [vmem:[%s884_s2] sm:$0xff]  ;;  %v605_v55 = vpack.c.bf16 %v114_v48, %v106_v47  ;;  %v80_v11 = vld [vmem:[#allocation2 + $0xd0] sm:$0xff] }
  0x38   :  { %v115_v40 = vld [vmem:[#allocation2 + $0x1e8] sm:$0xff]  ;;  %121 = vperm.xlu0 %636, %v118_v54   ;;  %v46_v2 = vld [vmem:[#allocation5] sm:$0xff]  ;;  %v76_v12 = vld [vmem:[#allocation2 + $0xb0] sm:$0xff]  ;;  %v581_v18 = vpack.c.bf16 %v80_v11, %v72_v10 }
  0x39   :  { %v603_v44 = vpack.c.bf16 %v115_v40, %v107_v39  ;;  %v50_v4 = vld [vmem:[#allocation5 + $0x20] sm:$0xff]  ;;  %v84_v13 = vld [vmem:[#allocation2 + $0xf0] sm:$0xff]  ;;  %v89_v14 = vld [vmem:[#allocation2 + $0x118] sm:$0xff] }
  0x3a   :  { %v97_v15 = vld [vmem:[#allocation2 + $0x158] sm:$0xff]  ;;  %v613_v19 = vpack.c.bf16 %v84_v13, %v76_v12  ;;  %v88_v22 = vld [vmem:[#allocation2 + $0x110] sm:$0xff] }
  0x3b   :  { %v93_v16 = vld [vmem:[#allocation2 + $0x138] sm:$0xff]  ;;  %v583_v20 = vpack.c.bf16 %v97_v15, %v89_v14  ;;  %v96_v23 = vld [vmem:[#allocation2 + $0x150] sm:$0xff] }
  0x3c   :  { %570 = vmatpush1.bf16.xpose.msra.mxu1 %v569_v41  ;;  %v101_v17 = vld [vmem:[#allocation2 + $0x178] sm:$0xff]  ;;  %v92_v24 = vld [vmem:[#allocation2 + $0x130] sm:$0xff]  ;;  %v585_v30 = vpack.c.bf16 %v96_v23, %v88_v22 }
  0x3d   :  { %572 = vmatprep.subr.bf16.mxu1 %v571_v43  ;;  %v615_v21 = vpack.c.bf16 %v101_v17, %v93_v16  ;;  %v100_v25 = vld [vmem:[#allocation2 + $0x170] sm:$0xff]  ;;  %v105_v26 = vld [vmem:[#allocation2 + $0x198] sm:$0xff] }
  0x3e   :  { %602 = vmatpush1.bf16.xpose.msra.mxu0 %v601_v42  ;;  %v113_v27 = vld [vmem:[#allocation2 + $0x1d8] sm:$0xff]  ;;  %v617_v31 = vpack.c.bf16 %v100_v25, %v92_v24  ;;  %v104_v34 = vld [vmem:[#allocation2 + $0x190] sm:$0xff] }
  0x3f   :  { %604 = vmatprep.subr.bf16.mxu0 %v603_v44  ;;  %v109_v28 = vld [vmem:[#allocation2 + $0x1b8] sm:$0xff]  ;;  %v587_v32 = vpack.c.bf16 %v113_v27, %v105_v26  ;;  %v112_v35 = vld [vmem:[#allocation2 + $0x1d0] sm:$0xff] }
  0x40   :  { %v117_v29 = vld [vmem:[#allocation2 + $0x1f8] sm:$0xff]  ;;  %v108_v36 = vld [vmem:[#allocation2 + $0x1b0] sm:$0xff]  ;;  %v589_v38 = vpack.c.bf16 %v112_v35, %v104_v34 }
  0x41   :  { %v619_v33 = vpack.c.bf16 %v117_v29, %v109_v28  ;;  %v116_v37 = vld [vmem:[#allocation2 + $0x1f0] sm:$0xff] }
  0x42   :  { %v621_v39 = vpack.c.bf16 %v116_v37, %v108_v36  ;;  %v48_v40 = vld [vmem:[#allocation5 + $0x10] sm:$0xff] }
  0x43   :  { %v52_v41 = vld [vmem:[#allocation5 + $0x30] sm:$0xff] }
  0x44   :  { %574 = vmatpush1.bf16.xpose.msra.mxu1 %v573_v53 }
  0x45   :  { %576 = vmatprep.subr.bf16.mxu1 %v575_v56 }
  0x46   :  { %606 = vmatpush1.bf16.xpose.msra.mxu0 %v605_v55 }
  0x47   :  { %608 = vmatprep.subr.bf16.mxu0 %v607_v57 }
  0x4b   :  { %189 = vmatmul.mubr.f32.vlgmr.msra.gmra.mrb[0].mxu1 %v46_v2 }
  0x4c   :  { %578 = vmatpush1.bf16.xpose.msra.mxu1 %v577_v3  ;;  %258 = vmatprep.mubr.f32.mxu1 %v49_v8 }
  0x4d   :  { %329 = vmatmul.mubr.f32.vlgmr.msra.gmra.mrb[0].mxu0 %v50_v4  ;;  %580 = vmatprep.subr.bf16.mxu1 %v579_v6 }
  0x4e   :  { %610 = vmatpush1.bf16.xpose.msra.mxu0 %v609_v5  ;;  %398 = vmatprep.mubr.f32.mxu0 %v53_v9 }
  0x4f   :  { %612 = vmatprep.subr.bf16.mxu0 %v611_v7 }
  0x54   :  { %582 = vmatpush1.bf16.xpose.msra.mxu1 %v581_v18 }
  0x55   :  { %584 = vmatprep.subr.bf16.mxu1 %v583_v20 }
  0x56   :  { %614 = vmatpush1.bf16.xpose.msra.mxu0 %v613_v19 }
  0x57   :  { %616 = vmatprep.subr.bf16.mxu0 %v615_v21 }
  0x5c   :  { %586 = vmatpush1.bf16.xpose.msra.mxu1 %v585_v30 }
  0x5d   :  { %588 = vmatprep.subr.bf16.mxu1 %v587_v32 }
  0x5e   :  { %618 = vmatpush1.bf16.xpose.msra.mxu0 %v617_v31 }
  0x5f   :  { %620 = vmatprep.subr.bf16.mxu0 %v619_v33 }
  0x64   :  { %590 = vmatpush1.bf16.xpose.msra.mxu1 %v589_v38 }
  0x66   :  { %622 = vmatpush1.bf16.xpose.msra.mxu0 %v621_v39 }
  0x6b   :  { %259 = vmatmul.mubr.f32.vlgmr.msra.gmra.mrb[0].mxu1 %v48_v40 }
  0x6d   :  { %399 = vmatmul.mubr.f32.vlgmr.msra.gmra.mrb[0].mxu0 %v52_v41 }
  0xb7   :  { %v122_v42 = vpop.permute.xlu0 %121 }
 0x13e   :  { %v260_v43 = vpop.f32.mrb[0].mxu1 }
 0x13f   :  { %v623_v44 = vadd.f32 %v260_v43, %v122_v42  ;;  %v262_v46 = vpop.f32.mrb[1].mxu1 }
 0x140   :  { %v400_v45 = vpop.f32.mrb[0].mxu0 }
 0x141   :  { %v402_v47 = vpop.f32.mrb[1].mxu0  ;;  %v624_v48 = vadd.f32 %v623_v44, %v400_v45 }
 0x143   :  { %v406_v49 = vsel %vm404_vm0, %v624_v48, -inf  ;;  %405 = vst.msk [vmem:[#allocation7] sm:$0xff] %vm404_vm0, %v624_v48 }
 0x144   :  { %407 = vmax.xlane.f32.xlu0 %v406_v49 }
 0x1d1   :  { %v408_v50 = vpop.xlane.xlu0 %407 }
 0x1d2   :  { %v409_v51 = vsub.f32 %v624_v48, %v408_v50 }
 0x1d4   :  { %v410_v52 = vmul.f32 1.442695, %v409_v51 }
 0x1d6   :  { %637 = vpow2.f32 %v410_v52 }
 0x1e0   :  { %v638_v53 = vpop.eup %637 }
 0x1e1   :  { %v412_v54 = vsel %vm404_vm0, %v638_v53, 0.0 }
 0x1e2   :  { %413 = vadd.xlane.f32.xlu1 %v412_v54 }
 0x26f   :  { %v414_v55 = vpop.xlane.xlu1 %413 }
 0x270   :  { %639 = vrcp.f32 %v414_v55 }
 0x27a   :  { %v640_v56 = vpop.eup %639 }
 0x27b   :  { %v416_v57 = vmul.f32 %v640_v56, %v638_v53 }
 0x27d   :  { %v420_v58 = vsel %vm404_vm0, %v416_v57, -inf  ;;  %417 = vst.msk [vmem:[#allocation8] sm:$0xff] %vm404_vm0, %v416_v57 }
 0x27e   :  { %421 = vmax.xlane.f32.xlu1 %v420_v58 }
 0x30b   :  { %v813_v61 = vpop.xlane.xlu1 %421 }
 0x30c   :  { %vm423_vm1 = vcmp.eq.f32.partialorder %v416_v57, %v813_v61  ;;  %v441_v48 = vsel %vm440_vm6, %v813_v61, 0.0 }
 0x30d   :  { %v424_v62 = vsel %vm423_vm1, %v811_v60, 64 }
 0x30e   :  { %v425_v63 = vsel %vm404_vm0, %v424_v62, 2147483647 }
 0x30f   :  { %v427_v0 = vshra.s32 %v425_v63, 16  ;;  %v426_v2 = vand.u32 65535, %v425_v63 }
 0x311   :  { %v429_v1 = vcvt.s32.f32 %v427_v0  ;;  %v428_v4 = vcvt.s32.f32 %v426_v2 }
 0x313   :  { %430 = vmin.xlane.f32.xlu1 %v429_v1 }
 0x3a0   :  { %v431_v3 = vpop.xlane.xlu1 %430 }
 0x3a1   :  { %vm432_vm2 = vcmp.eq.f32.partialorder %v429_v1, %v431_v3  ;;  %v437_v6 = vcvt.f32.s32 %v431_v3 }
 0x3a2   :  { %v433_v5 = vsel %vm432_vm2, %v428_v4, inf }
 0x3a3   :  { %434 = vmin.xlane.f32.xlu1 %v433_v5  ;;  %v438_v8 = vshll.u32 %v437_v6, 16 }
 0x430   :  { %v435_v7 = vpop.xlane.xlu1 %434 }
 0x431   :  { %v436_v9 = vcvt.f32.s32 %v435_v7 }
 0x433   :  { %v439_v10 = vadd.s32 %v438_v8, %v436_v9 }
 0x435   :  { %vm443_vm3 = vcmp.eq.s32.totalorder %v811_v60, %v439_v10  ;;  %v442_v27 = vsel %vm440_vm6, %v439_v10, 0 }
 0x436   :  { %v444_v11 = vsel %vm443_vm3, -inf, %v416_v57 }
 0x437   :  { %v445_v12 = vsel %vm404_vm0, %v444_v11, -inf }
 0x438   :  { %446 = vmax.xlane.f32.xlu1 %v445_v12 }
 0x4c5   :  { %v447_v13 = vpop.xlane.xlu1 %446 }
 0x4c6   :  { %vm448_vm4 = vcmp.eq.f32.partialorder %v444_v11, %v447_v13  ;;  %v466_v49 = vsel %vm465_vm7, %v447_v13, %v441_v48 }
 0x4c7   :  { %v449_v14 = vsel %vm448_vm4, %v811_v60, 64 }
 0x4c8   :  { %v450_v15 = vsel %vm404_vm0, %v449_v14, 2147483647 }
 0x4c9   :  { %v452_v16 = vshra.s32 %v450_v15, 16  ;;  %v451_v18 = vand.u32 65535, %v450_v15 }
 0x4cb   :  { %v454_v17 = vcvt.s32.f32 %v452_v16  ;;  %v453_v20 = vcvt.s32.f32 %v451_v18 }
 0x4cd   :  { %455 = vmin.xlane.f32.xlu1 %v454_v17 }
 0x55a   :  { %v456_v19 = vpop.xlane.xlu1 %455 }
 0x55b   :  { %vm457_vm5 = vcmp.eq.f32.partialorder %v454_v17, %v456_v19  ;;  %v462_v22 = vcvt.f32.s32 %v456_v19 }
 0x55c   :  { %v458_v21 = vsel %vm457_vm5, %v453_v20, inf }
 0x55d   :  { %459 = vmin.xlane.f32.xlu1 %v458_v21  ;;  %v463_v24 = vshll.u32 %v462_v22, 16 }
 0x5ea   :  { %v460_v23 = vpop.xlane.xlu1 %459 }
 0x5eb   :  { %v461_v25 = vcvt.f32.s32 %v460_v23 }
 0x5ed   :  { %v464_v26 = vadd.s32 %v463_v24, %v461_v25 }
 0x5ef   :  { %v467_v28 = vsel %vm465_vm7, %v464_v26, %v442_v27  ;;  %vm468_vm8 = vcmp.eq.s32.totalorder %v811_v60, %v464_v26 }
 0x5f0   :  { %v469_v29 = vsel %vm468_vm8, -inf, %v444_v11 }
 0x5f1   :  { %v470_v30 = vsel %vm404_vm0, %v469_v29, -inf }
 0x5f2   :  { %471 = vmax.xlane.f32.xlu1 %v470_v30 }
 0x67f   :  { %v472_v31 = vpop.xlane.xlu1 %471 }
 0x680   :  { %vm473_vm9 = vcmp.eq.f32.partialorder %v469_v29, %v472_v31  ;;  %v491_v50 = vsel %vm490_vm11, %v472_v31, %v466_v49 }
 0x681   :  { %v474_v32 = vsel %vm473_vm9, %v811_v60, 64 }
 0x682   :  { %v475_v33 = vsel %vm404_vm0, %v474_v32, 2147483647 }
 0x683   :  { %v477_v34 = vshra.s32 %v475_v33, 16  ;;  %v476_v36 = vand.u32 65535, %v475_v33 }
 0x685   :  { %v479_v35 = vcvt.s32.f32 %v477_v34  ;;  %v478_v38 = vcvt.s32.f32 %v476_v36 }
 0x687   :  { %480 = vmin.xlane.f32.xlu1 %v479_v35 }
 0x714   :  { %v481_v37 = vpop.xlane.xlu1 %480 }
 0x715   :  { %vm482_vm10 = vcmp.eq.f32.partialorder %v479_v35, %v481_v37  ;;  %v487_v40 = vcvt.f32.s32 %v481_v37 }
 0x716   :  { %v483_v39 = vsel %vm482_vm10, %v478_v38, inf }
 0x717   :  { %484 = vmin.xlane.f32.xlu0 %v483_v39  ;;  %v488_v42 = vshll.u32 %v487_v40, 16 }
 0x7a4   :  { %v485_v41 = vpop.xlane.xlu0 %484 }
 0x7a5   :  { %v486_v43 = vcvt.f32.s32 %v485_v41 }
 0x7a7   :  { %v489_v44 = vadd.s32 %v488_v42, %v486_v43 }
 0x7a9   :  { %v833_v45 = vsel %vm490_vm11, %v489_v44, %v467_v28  ;;  %vm493_vm12 = vcmp.eq.s32.totalorder %v811_v60, %v489_v44 }
 0x7aa   :  { %v494_v46 = vsel %vm493_vm12, -inf, %v469_v29 }
 0x7ab   :  { %v495_v47 = vsel %vm404_vm0, %v494_v46, -inf }
 0x7ac   :  { %496 = vmax.xlane.f32.xlu1 %v495_v47 }
 0x839   :  { %v497_v51 = vpop.xlane.xlu1 %496 }
 0x83a   :  { %vm498_vm15 = vcmp.eq.f32.partialorder %v494_v46, %v497_v51  ;;  %v516_v52 = vsel %vm515_vm13, %v497_v51, %v491_v50 }
 0x83b   :  { %v499_v53 = vsel %vm498_vm15, %v811_v60, 64  ;;  %519 = vst.msk [vmem:[%s887_s5] sm:$0xff] %vm518_vm14, %v516_v52 }
 0x83c   :  { %v500_v54 = vsel %vm404_vm0, %v499_v53, 2147483647 }
 0x83d   :  { %v502_v55 = vshra.s32 %v500_v54, 16  ;;  %v501_v57 = vand.u32 65535, %v500_v54 }
 0x83f   :  { %v504_v56 = vcvt.s32.f32 %v502_v55  ;;  %v503_v59 = vcvt.s32.f32 %v501_v57 }
 0x841   :  { %505 = vmin.xlane.f32.xlu0 %v504_v56 }
 0x8ce   :  { %v506_v58 = vpop.xlane.xlu0 %505 }
 0x8cf   :  { %vm507_vm1 = vcmp.eq.f32.partialorder %v504_v56, %v506_v58 }
 0x8d0   :  { %v508_v61 = vsel %vm507_vm1, %v503_v59, inf }
 0x8d1   :  { %509 = vmin.xlane.f32.xlu1 %v508_v61 }
 0x8d2   :  { %696 = shalt.err (!%p693_p6)
}
 0x8d3   :  { %s697_s30 = scalar_lea.hbm %s885_s3, 128 }
 0x8d4   :  { %p698_p7 = scmp.ne.s32.totalorder %s885_s3, %s697_s30  ;;  %p701_p8 = scmp.lt.u32.totalorder %s697_s30, %s885_s3 }
 0x8d6   :  { %p703_p9 = pnand %p701_p8, %p698_p7 }
 0x8d8   :  { %706 = shalt.err (!%p703_p9)
}
 0x8d9   :  { %530 = dma.vmem_to_hbm [thread:$0]  %s528_s25, 128, %s885_s3, [#allocation4]  }
 0x8da   :  { %s707_s13 = scalar_lea.vmem %s538_s27, 128  ;;  %p712_p11 = scmp.lt.s32.totalorder %s538_s27, %s538_s27 }
 0x8db   :  { %p708_p10 = scmp.ne.s32.totalorder %s538_s27, %s707_s13  ;;  %p713_p12 = scmp.lt.s32.totalorder %s707_s13, %s707_s13 }
 0x8dd   :  { %p714_p13 = por %p713_p12, %p712_p11 }
 0x8df   :  { %p715_p0 = pnand %p714_p13, %p708_p10 }
 0x8e1   :  { %718 = shalt.err (!%p715_p0)
}
 0x8e2   :  { %s719_s16 = scalar_lea.hbm %s886_s4, 128 }
 0x8e3   :  { %p720_p1 = scmp.ne.s32.totalorder %s886_s4, %s719_s16  ;;  %p723_p2 = scmp.lt.u32.totalorder %s719_s16, %s886_s4 }
 0x8e5   :  { %p725_p3 = pnand %p723_p2, %p720_p1 }
 0x8e7   :  { %728 = shalt.err (!%p725_p3)
}
 0x8e8   :  { %540 = dma.vmem_to_hbm [thread:$0]  %s538_s27, 128, %s886_s4, [#allocation9]   ;;  %v512_v62 = vcvt.f32.s32 %v506_v58 }
 0x8ea   :  { %v513_v0 = vshll.u32 %v512_v62, 16 }
 0x95e   :  { %v510_v63 = vpop.xlane.xlu1 %509 }
 0x95f   :  { %v511_v1 = vcvt.f32.s32 %v510_v63 }
 0x961   :  { %v514_v2 = vadd.s32 %v513_v0, %v511_v1 }
 0x963   :  { %v517_v3 = vsel %vm515_vm13, %v514_v2, %v833_v45 }
 0x964   :  { %520 = vst.msk [vmem:[%s888_s6] sm:$0xff] %vm518_vm14, %v517_v3 }
 0x965   :  { %733 = dma.done.wait [#allocation4], 128  }
 0x966   :  { %734 = vsyncadd [#allocation4], 4294967168 }
 0x967   :  { %735 = dma.done.wait [#allocation9], 128  }
 0x968   :  { %736 = vsyncadd [#allocation9], 4294967168 }
 0x969   :  { %555 = vsyncpa [#allocation3], 1 }
 0x96a   :  { %556 = vsyncpa [#allocation6], 1 }
 0x96b   :  { %557 = vsyncpa [#allocation4], 1 }
 0x96c   :  { %558 = vsyncpa [#allocation9], 1 }

</bundles_post_ra>
